<compile_context>
chip_gen: v7x
topology: tpu7x:2x2x1
jax: 0.10.0
libtpu: 0.0.40
codegen_flags: <defaults>
</compile_context>

<pallas_src>
import functools

import jax
import jax.numpy as jnp
from jax.experimental import pallas as pl
from jax.experimental.pallas import tpu as pltpu

LANES = 128
SUBLANES = 8
MAX_TILE_BYTES = 2 * 1024 * 1024  # ~2 MiB per tile: good across v5e/v6e/v7x


def _symmetric_quant_kernel(scalars_ref, x_ref, o_ref, *, val_min, val_max):
    # scalars_ref: SMEM f32[2] = [scale_eff, 1/scale_eff], computed once in the wrapper.
    s = scalars_ref[0]
    inv_s = scalars_ref[1]
    x = x_ref[...].astype(jnp.float32)               # widen in-kernel (free VALU slack)
    clamped = jnp.clip(x * s, val_min, val_max)
    quant = jnp.round(clamped)                       # half-to-even == torch.round
    o_ref[...] = (quant * inv_s).astype(o_ref.dtype) # narrow back to input dtype


def symmetric_quantize(x, scale_param, bits=8):
    """Fake-quantize `x` of any shape/float dtype with a scalar learned scale."""
    val_min = float(-(2 ** (bits - 1)))
    val_max = float(2 ** (bits - 1) - 1)

    orig_shape = x.shape
    orig_dtype = x.dtype
    total = x.size

    # --- choose a large, VMEM-safe tile ---------------------------------------
    dtype_bytes = jnp.dtype(orig_dtype).itemsize
    max_tile_rows = max(
        SUBLANES, (MAX_TILE_BYTES // (LANES * dtype_bytes)) // SUBLANES * SUBLANES
    )
    rows = pl.cdiv(total, LANES)
    rows_rounded = pl.cdiv(rows, SUBLANES) * SUBLANES
    tile_rows = min(max_tile_rows, rows_rounded)
    padded_rows = pl.cdiv(rows, tile_rows) * tile_rows
    grid = (padded_rows // tile_rows,)

    # --- flatten + pad to a whole number of tiles (keep original dtype) --------
    flat = x.reshape(-1)
    pad = padded_rows * LANES - total
    if pad:
        flat = jnp.pad(flat, (0, pad))
    x2d = flat.reshape(padded_rows, LANES)

    # --- hoist scalar math out of the kernel: [scale_eff, 1/scale_eff] in SMEM -
    scale_f32 = jnp.asarray(scale_param, jnp.float32).reshape(-1)[0]
    s = val_max / scale_f32
    inv_s = 1.0 / s
    scalars_smem = jnp.stack([s, inv_s])

    kernel = functools.partial(
        _symmetric_quant_kernel, val_min=val_min, val_max=val_max
    )

    out2d = pl.pallas_call(
        kernel,
        out_shape=jax.ShapeDtypeStruct((padded_rows, LANES), orig_dtype),
        grid_spec=pltpu.PrefetchScalarGridSpec(
            num_scalar_prefetch=0,
            grid=grid,
            in_specs=[
                pl.BlockSpec(memory_space=pltpu.MemorySpace.SMEM),      # [s, 1/s]
                pl.BlockSpec((tile_rows, LANES), lambda i: (i, 0)),      # input tile
            ],
            out_specs=pl.BlockSpec((tile_rows, LANES), lambda i: (i, 0)),
        ),
        compiler_params=pltpu.CompilerParams(
            dimension_semantics=("parallel",),  # lets v7x split steps across its 2 TCs
        ),
    )(scalars_smem, x2d)

    out_flat = out2d.reshape(-1)
    if pad:
        out_flat = out_flat[:total]
    return out_flat.reshape(orig_shape)


def _reference(x, scale_param, bits=8):
    val_min = -(2 ** (bits - 1))
    val_max = 2 ** (bits - 1) - 1
    s = val_max / jnp.asarray(scale_param, jnp.float32).reshape(-1)[0]
    xf = x.astype(jnp.float32)
    clamped = jnp.clip(xf * s, val_min, val_max)
    quant = jnp.round(clamped)
    return (quant * (1.0 / s)).astype(x.dtype)


if __name__ == "__main__":
    key = jax.random.PRNGKey(0)
    # NCHW input, like a conv activation in the original diffusion model.
    x = jax.random.normal(key, (2, 4, 16, 16), dtype=jnp.float32)

    # Deterministic parameter init: nn.Parameter(torch.ones(shape)) with shape=(1,)
    scale_param = jnp.ones((1,), dtype=jnp.float32)

    out = symmetric_quantize(x, scale_param, bits=8)
    out = jax.block_until_ready(out)

    ref = _reference(x, scale_param, bits=8)
    assert out.shape == x.shape and out.dtype == x.dtype
    assert jnp.allclose(out, ref, atol=1e-6, rtol=1e-6)

    # Also exercise a non-1024-divisible, odd-sized bf16 input (pad/slice path,
    # in-kernel up/down cast) to make sure the general wrapper works.
    x2 = jax.random.normal(jax.random.PRNGKey(1), (3, 5, 7, 11), dtype=jnp.bfloat16)
    out2 = jax.block_until_ready(symmetric_quantize(x2, scale_param, bits=8))
    ref2 = _reference(x2, scale_param, bits=8)
    assert out2.shape == x2.shape and out2.dtype == x2.dtype
    assert jnp.allclose(out2.astype(jnp.float32), ref2.astype(jnp.float32),
                        atol=1e-2, rtol=1e-2)

    print("KERNEL_OK")
</pallas_src>

<mosaic_0001>
module attributes {stable_mosaic.version = 11 : i64} {
  func.func @_symmetric_quant_kernel(%arg0: i32, %arg1: memref<2xf32, #tpu.memory_space<smem>>, %arg2: memref<16x128xf32, #tpu.memory_space<vmem>>, %arg3: memref<16x128xf32, #tpu.memory_space<vmem>>) attributes {dimension_semantics = [#tpu.dimension_semantics<parallel>], iteration_bounds = array<i64: 1>, scalar_prefetch = 0 : i64, scratch_operands = 0 : i64, tpu.core_type = #tpu.core_type<tc>, window_params = [{transform_indices = @transform_0, window_bounds = array<i64: 2>}, {transform_indices = @transform_1, window_bounds = array<i64: 16, 128>}, {transform_indices = @transform_2, window_bounds = array<i64: 16, 128>}]} {
    %c0 = arith.constant 0 : index
    %0 = memref.load %arg1[%c0] : memref<2xf32, #tpu.memory_space<smem>>
    %c1 = arith.constant 1 : index
    %1 = memref.load %arg1[%c1] : memref<2xf32, #tpu.memory_space<smem>>
    %c0_0 = arith.constant 0 : index
    %c0_1 = arith.constant 0 : index
    %2 = vector.load %arg2[%c0_0, %c0_1] : memref<16x128xf32, #tpu.memory_space<vmem>>, vector<16x128xf32>
    %3 = vector.broadcast %0 : f32 to vector<16x128xf32>
    %4 = arith.mulf %2, %3 : vector<16x128xf32>
    %cst = arith.constant -1.280000e+02 : f32
    %cst_2 = arith.constant 1.270000e+02 : f32
    %5 = vector.broadcast %cst : f32 to vector<16x128xf32>
    %6 = arith.maximumf %5, %4 : vector<16x128xf32>
    %7 = vector.broadcast %cst_2 : f32 to vector<16x128xf32>
    %8 = arith.minimumf %7, %6 : vector<16x128xf32>
    %9 = math.roundeven %8 : vector<16x128xf32>
    %10 = vector.broadcast %1 : f32 to vector<16x128xf32>
    %11 = arith.mulf %9, %10 : vector<16x128xf32>
    %c0_3 = arith.constant 0 : index
    %c0_4 = arith.constant 0 : index
    %12 = vector.load %arg3[%c0_3, %c0_4] : memref<16x128xf32, #tpu.memory_space<vmem>>, vector<16x128xf32>
    tpu.vector_store %arg3[%c0_3, %c0_4], %11 {strides = array<i32>} : memref<16x128xf32, #tpu.memory_space<vmem>>, vector<16x128xf32>,
    return
  }
  func.func @transform_0(%arg0: i32) -> i32 {
    %c0_i32 = arith.constant 0 : i32
    %c0_i32_0 = arith.constant 0 : i32
    return %c0_i32 : i32
  }
  func.func @transform_1(%arg0: i32) -> (i32, i32) {
    %c0_i32 = arith.constant 0 : i32
    %c0_i32_0 = arith.constant 0 : i32
    return %arg0, %c0_i32 : i32, i32
  }
  func.func @transform_2(%arg0: i32) -> (i32, i32) {
    %c0_i32 = arith.constant 0 : i32
    %c0_i32_0 = arith.constant 0 : i32
    return %arg0, %c0_i32 : i32, i32
  }
}

</mosaic_0001>

<bundles_post_ra>
// kernel: tpu_custom_call.1
= control target key start
LH: loop header
LB: loop body
LE: loop exit
PB: predicated region body
PF: predicated region fallthrough
CT: control target
= control target key end

     0   :  { %7 = vsyncpa [#allocation5], 0  ;;  %s203_s0 = inlined_call_operand.hbm [shape: f32[2], index: 0, kind: input, shape index: {}]   ;;  %s204_s1 = inlined_call_operand.hbm [shape: f32[16,128], index: 1, kind: input, shape index: {}]   ;;  %s205_s2 = inlined_call_operand.hbm [shape: f32[16,128], index: 2, kind: output, shape index: {}]  }
   0x1   :  { %8 = vsyncpa [#allocation3], 0 }
   0x2   :  { %9 = vsyncpa [#allocation4], 0  ;;  %s81_s11 = scalar_lea.hbm %s203_s0, 16 }
   0x3   :  { %p82_p0 = scmp.ne.s32.totalorder %s203_s0, %s81_s11  ;;  %p85_p1 = scmp.lt.u32.totalorder %s81_s11, %s203_s0 }
   0x5   :  { %p87_p2 = pnand %p85_p1, %p82_p0 }
   0x7   :  { %90 = shalt.err (!%p87_p2)
}
   0x8   :  { %s141_s16 = smov [#allocation2]   ;;  %s142_s19 = smov [#allocation6]  }
   0x9   :  { %17 = dma.hbm_to_smem %s203_s0, 16, %s141_s16, [#allocation5]  }
   0xa   :  { %s23_s20 = sshll.u32 %s142_s19, 4  ;;  %s91_s23 = scalar_lea.hbm %s204_s1, 256  ;;  %s24_s20 = int_to_ptr.vmem [resolvable:$true] %s23_s20 }
   0xb   :  { %p92_p3 = scmp.ne.s32.totalorder %s204_s1, %s91_s23  ;;  %p95_p4 = scmp.lt.u32.totalorder %s91_s23, %s204_s1 }
   0xd   :  { %p97_p5 = pnand %p95_p4, %p92_p3 }
   0xf   :  { %100 = shalt.err (!%p97_p5)
}
  0x10   :  { %s101_s28 = scalar_lea.vmem %s24_s20, 256  ;;  %p106_p7 = scmp.lt.s32.totalorder %s24_s20, %s24_s20 }
  0x11   :  { %p102_p6 = scmp.ne.s32.totalorder %s24_s20, %s101_s28  ;;  %p107_p8 = scmp.lt.s32.totalorder %s101_s28, %s101_s28 }
  0x13   :  { %p108_p9 = por %p107_p8, %p106_p7 }
  0x15   :  { %p109_p10 = pnand %p108_p9, %p102_p6 }
  0x17   :  { %112 = shalt.err (!%p109_p10)
}
  0x18   :  { %s143_s0 = smov 128   ;;  %s144_s29 = smov 8  }
  0x19   :  { %29 = dma.hbm_to_vmem [thread:$0]  %s204_s1, 256, %s24_s20, [#allocation3], %s143_s0, %s143_s0, %s144_s29  }
  0x1a   :  { %135 = dma.done.wait [#allocation5], 16  }
  0x1b   :  { %136 = vsyncadd [#allocation5], 4294967280 }
  0x1c   :  { %137 = dma.done.wait [#allocation3], 256  }
  0x1d   :  { %138 = vsyncadd [#allocation3], 4294967040 }
  0x1e   :  { %36 = sfence }
  0x1f   :  { %s37_s4 = sld [smem:[#allocation2]]  ;;  %s73_s5 = sld [smem:[#allocation2 + $0x1]]  ;;  %v39_v0 = vld [vmem:[#allocation6] sm:$0xff]  ;;  %v40_v1 = vld [vmem:[#allocation6 + $0x8] sm:$0xff] }
  0x20   :  { %s145_s6 = smov [#allocation7]  }
  0x21   :  { %s60_s7 = sshll.u32 %s145_s6, 4  ;;  %s61_s7 = int_to_ptr.vmem [resolvable:$true] %s60_s7 }
  0x22   :  { %s113_s1 = scalar_lea.vmem %s61_s7, 256  ;;  %p118_p12 = scmp.lt.s32.totalorder %s61_s7, %s61_s7 }
  0x23   :  { %p114_p11 = scmp.ne.s32.totalorder %s61_s7, %s113_s1  ;;  %p119_p13 = scmp.lt.s32.totalorder %s113_s1, %s113_s1 }
  0x25   :  { %v41_v2 = vstv %s37_s4  ;;  %v50_v9 = vstv %s73_s5  ;;  %p120_p0 = por %p119_p13, %p118_p12 }
  0x26   :  { %v42_v3 = vmul.f32 %v41_v2, %v39_v0  ;;  %v43_v4 = vmul.f32 %v41_v2, %v40_v1 }
  0x27   :  { %p121_p1 = pnand %p120_p0, %p114_p11 }
  0x28   :  { %v44_v5 = vmax.f32 %v42_v3, -128.0  ;;  %v45_v6 = vmax.f32 %v43_v4, -128.0 }
  0x2a   :  { %v46_v7 = vmin.f32 %v44_v5, 127.0  ;;  %v47_v8 = vmin.f32 %v45_v6, 127.0 }
  0x2c   :  { %v74_v10 = vround.rtne.f32 %v46_v7  ;;  %v75_v11 = vround.rtne.f32 %v47_v8 }
  0x2e   :  { %v51_v12 = vmul.f32 %v74_v10, %v50_v9  ;;  %v52_v13 = vmul.f32 %v75_v11, %v50_v9 }
  0x30   :  { %53 = vst [vmem:[#allocation7] sm:$0xff] %v51_v12  ;;  %54 = vst [vmem:[#allocation7 + $0x8] sm:$0xff] %v52_v13 }
  0x31   :  { %124 = shalt.err (!%p121_p1)
}
  0x32   :  { %s125_s10 = scalar_lea.hbm %s205_s2, 256 }
  0x33   :  { %p126_p2 = scmp.ne.s32.totalorder %s205_s2, %s125_s10  ;;  %p129_p3 = scmp.lt.u32.totalorder %s125_s10, %s205_s2 }
  0x35   :  { %p131_p4 = pnand %p129_p3, %p126_p2 }
  0x37   :  { %134 = shalt.err (!%p131_p4)
}
  0x38   :  { %66 = dma.vmem_to_hbm [thread:$0]  %s61_s7, 256, %s205_s2, [#allocation4], %s143_s0, %s143_s0, %s144_s29  }
  0x39   :  { %139 = dma.done.wait [#allocation4], 256  }
  0x3a   :  { %140 = vsyncadd [#allocation4], 4294967040 }
  0x3b   :  { %70 = vsyncpa [#allocation3], 1 }
  0x3c   :  { %71 = vsyncpa [#allocation4], 1 }
  0x3d   :  { %72 = vsyncpa [#allocation5], 1 }

</bundles_post_ra>
